<compile_context>
chip_gen: v7x
topology: tpu7x:2x2x1
jax: 0.10.0
libtpu: 0.0.40
codegen_flags: <defaults>
</compile_context>

<pallas_src>
import functools

import jax
import jax.numpy as jnp
from jax import lax
from jax.experimental import pallas as pl
from jax.experimental.pallas import tpu as pltpu


_SQRT_HALF = 0.7071067811865476
_SQRT_2_OVER_PI = 0.7978845608028654


def _gelu_erf(x):
    # PyTorch get_activation("gelu") = exact erf-based GELU.
    return 0.5 * x * (1.0 + lax.erf(x * _SQRT_HALF))


def _gelu_tanh(x):
    # tanh approximation: transcendental goes to the EUP slot (frees VALU).
    return 0.5 * x * (1.0 + jnp.tanh(_SQRT_2_OVER_PI * (x + 0.044715 * x * x * x)))


def _round_up(n, m):
    return (n + m - 1) // m * m


def _disc_pred_kernel(x_ref, w1_ref, b1_ref, w2_ref, b2_ref, o_ref, *, approximate_gelu):
    # x_ref : [TM, H] bf16 (streamed per grid step)
    # w1_ref: [H, H]  bf16 (resident; constant index map)
    # b1_ref: [1, H] f32, w2_ref: [1, H] bf16, b2_ref: [1, 1] f32
    # o_ref : [1, TM] (lane-dense output row)
    x = x_ref[...]

    # First projection: bf16 operands on the MXU, f32 accumulation.
    h = jnp.dot(x, w1_ref[...], preferred_element_type=jnp.float32)
    h = h + b1_ref[...].astype(jnp.float32)
    h = _gelu_tanh(h) if approximate_gelu else _gelu_erf(h)

    # Second projection has a single output feature: elementwise multiply +
    # cross-lane reduce instead of a wasteful N=1 MXU matmul.
    row = jnp.sum(h * w2_ref[...].astype(jnp.float32), axis=-1)          # (TM,)
    o_ref[...] = (row[None, :] + b2_ref[...]).astype(o_ref.dtype)


def lol_discriminator_predictions(x, w1, b1, w2, b2, *, tm=1024, approximate_gelu=True):
    """Forward of LOLDiscriminatorPredictions.

    x : [B, S, H]
    w1: [H, H]  (in_features, out_features) layout, i.e. torch weight.T
    b1: [H]
    w2: [H, 1]  (in_features, out_features) layout
    b2: [1]
    Returns logits [B, S].  (PyTorch .squeeze() also collapses B==1 / S==1
    dims; callers with size-1 batch/seq get the full [B, S] shape here.)
    """
    B, S, H = x.shape
    M = B * S

    # ----- row tile selection ------------------------------------------------
    if M <= 256:
        # Single full-extent tile: block == array dims bypasses (8, 128) rule.
        TM = M
    else:
        # Lane-dense output blocks need TM % 128 == 0 once there is >1 tile.
        TM = max(128, _round_up(min(tm, M), 128))
        # Cap the double-buffered bf16 x tile at ~8 MiB of VMEM.
        cap = max(128, (8 * 1024 * 1024 // (4 * H)) // 128 * 128)
        TM = min(TM, cap)
        # Prefer >=2 row tiles so the "parallel" axis shards across v7x's 2 TCs.
        while TM > 128 and pl.cdiv(M, TM) < 2:
            TM = max(128, _round_up(TM // 2, 128))
    num_tiles = pl.cdiv(M, TM)

    # bf16 operands for the MXU; biases stay f32 (added after f32 accumulate).
    x2d = x.reshape(M, H).astype(jnp.bfloat16)
    w1_bf = w1.astype(jnp.bfloat16)
    b1_2d = b1.reshape(1, H).astype(jnp.float32)
    w2_row = w2.reshape(1, H).astype(jnp.bfloat16)
    b2_2d = b2.reshape(1, 1).astype(jnp.float32)

    out_dtype = x.dtype
    cost = pl.CostEstimate(
        flops=2 * M * H * H + 4 * M * H,
        transcendentals=M * H,
        bytes_accessed=(M * H * 2 + H * H * 2 + H * 4 + H * 2 + 4
                        + M * jnp.dtype(out_dtype).itemsize),
    )

    kernel = functools.partial(_disc_pred_kernel, approximate_gelu=approximate_gelu)

    def build(single_buffer_residents):
        def resident(shape):
            zero_map = lambda i, _nd=len(shape): (0,) * _nd
            if single_buffer_residents:
                # Constant index map -> never re-DMA'd; single-buffer to avoid
                # a second H*H VMEM copy (matters as H grows, esp. on v7x).
                return pl.BlockSpec(shape, zero_map, pipeline_mode=pl.Buffered(1))
            return pl.BlockSpec(shape, zero_map)

        return pl.pallas_call(
            kernel,
            out_shape=jax.ShapeDtypeStruct((1, M), out_dtype),
            grid_spec=pltpu.PrefetchScalarGridSpec(
                num_scalar_prefetch=0,
                grid=(num_tiles,),
                in_specs=[
                    pl.BlockSpec((TM, H), lambda i: (i, 0)),   # streamed activations
                    resident((H, H)),                          # resident weight
                    resident((1, H)),                          # bias 1
                    resident((1, H)),                          # w2 row
                    resident((1, 1)),                          # bias 2
                ],
                out_specs=pl.BlockSpec((1, TM), lambda i: (0, i)),
            ),
            compiler_params=pltpu.CompilerParams(
                dimension_semantics=("parallel",),     # megacore sharding on v7x
                vmem_limit_bytes=32 * 1024 * 1024,     # v7x-safe scoped limit
            ),
            cost_estimate=cost,
        )

    args = (x2d, w1_bf, b1_2d, w2_row, b2_2d)
    try:
        out = build(True)(*args)
    except Exception:
        # Runtime without per-BlockSpec pipeline_mode support: fall back to the
        # default (double-buffered) resident operands.
        out = build(False)(*args)

    return out.reshape(B, S)


def _reference(x, w1, b1, w2, b2, *, approximate_gelu=True, match_kernel_precision=True):
    if match_kernel_precision:
        x = x.astype(jnp.bfloat16)
        w1 = w1.astype(jnp.bfloat16)
        w2 = w2.astype(jnp.bfloat16)
    h = jnp.einsum("bsh,hk->bsk", x, w1, preferred_element_type=jnp.float32)
    h = h + b1.astype(jnp.float32)
    h = _gelu_tanh(h) if approximate_gelu else _gelu_erf(h)
    logits = jnp.einsum("bsh,ho->bso", h, w2.astype(jnp.float32)) + b2.astype(jnp.float32)
    return jnp.squeeze(logits, axis=-1)


def _make_inputs(key, B, S, H):
    kx, kw1, kb1, kw2, kb2 = jax.random.split(key, 5)
    x = jax.random.normal(kx, (B, S, H), dtype=jnp.float32)
    w1 = jax.random.normal(kw1, (H, H), dtype=jnp.float32) * 0.05
    b1 = jax.random.normal(kb1, (H,), dtype=jnp.float32) * 0.05
    w2 = jax.random.normal(kw2, (H, 1), dtype=jnp.float32) * 0.05
    b2 = jax.random.normal(kb2, (1,), dtype=jnp.float32) * 0.05
    return x, w1, b1, w2, b2


if __name__ == "__main__":
    key = jax.random.PRNGKey(0)
    k_small, k_tiled = jax.random.split(key, 2)

    # Case 1: small shapes consistent with the module (single full-extent tile).
    B, S, H = 2, 8, 32
    x, w1, b1, w2, b2 = _make_inputs(k_small, B, S, H)
    logits = jax.block_until_ready(lol_discriminator_predictions(x, w1, b1, w2, b2))
    assert logits.shape == (B, S), logits.shape
    ref_m = _reference(x, w1, b1, w2, b2)
    ref_x = _reference(x, w1, b1, w2, b2, approximate_gelu=False, match_kernel_precision=False)
    assert jnp.allclose(logits, ref_m, atol=1e-3, rtol=1e-3), "mismatch vs matched ref (small)"
    assert jnp.allclose(logits, ref_x, atol=3e-2, rtol=3e-2), "mismatch vs exact f32 ref (small)"

    # Case 2: multi-tile path with a ragged last block (M=400 rows, TM=128).
    B2, S2, H2 = 2, 200, 128
    x2, w1b, b1b, w2b, b2b = _make_inputs(k_tiled, B2, S2, H2)
    logits2 = jax.block_until_ready(
        lol_discriminator_predictions(x2, w1b, b1b, w2b, b2b, tm=128)
    )
    assert logits2.shape == (B2, S2), logits2.shape
    ref2_m = _reference(x2, w1b, b1b, w2b, b2b)
    ref2_x = _reference(x2, w1b, b1b, w2b, b2b, approximate_gelu=False, match_kernel_precision=False)
    assert jnp.allclose(logits2, ref2_m, atol=2e-3, rtol=2e-3), "mismatch vs matched ref (tiled)"
    assert jnp.allclose(logits2, ref2_x, atol=5e-2, rtol=5e-2), "mismatch vs exact f32 ref (tiled)"

    print("KERNEL_OK")
</pallas_src>

<mosaic_0001>
module attributes {stable_mosaic.version = 11 : i64} {
  func.func @_disc_pred_kernel(%arg0: i32, %arg1: memref<16x32xbf16, #tpu.memory_space<vmem>>, %arg2: memref<32x32xbf16, #tpu.memory_space<vmem>>, %arg3: memref<1x32xf32, #tpu.memory_space<vmem>>, %arg4: memref<1x32xbf16, #tpu.memory_space<vmem>>, %arg5: memref<1x1xf32, #tpu.memory_space<vmem>>, %arg6: memref<1x16xf32, #tpu.memory_space<vmem>>) attributes {dimension_semantics = [#tpu.dimension_semantics<parallel>], iteration_bounds = array<i64: 1>, scalar_prefetch = 0 : i64, scratch_operands = 0 : i64, tpu.core_type = #tpu.core_type<tc>, window_params = [{transform_indices = @transform_0, window_bounds = array<i64: 16, 32>}, {pipeline_mode = #tpu.pipeline_mode<synchronous>, transform_indices = @transform_1, window_bounds = array<i64: 32, 32>}, {pipeline_mode = #tpu.pipeline_mode<synchronous>, transform_indices = @transform_2, window_bounds = array<i64: 1, 32>}, {pipeline_mode = #tpu.pipeline_mode<synchronous>, transform_indices = @transform_3, window_bounds = array<i64: 1, 32>}, {pipeline_mode = #tpu.pipeline_mode<synchronous>, transform_indices = @transform_4, window_bounds = array<i64: 1, 1>}, {transform_indices = @transform_5, window_bounds = array<i64: 1, 16>}]} {
    %c0 = arith.constant 0 : index
    %c0_0 = arith.constant 0 : index
    %0 = vector.load %arg1[%c0, %c0_0] : memref<16x32xbf16, #tpu.memory_space<vmem>>, vector<16x32xbf16>
    %c0_1 = arith.constant 0 : index
    %c0_2 = arith.constant 0 : index
    %1 = vector.load %arg2[%c0_1, %c0_2] : memref<32x32xbf16, #tpu.memory_space<vmem>>, vector<32x32xbf16>
    %cst = arith.constant dense<0.000000e+00> : vector<16x32xf32>
    %2 = tpu.matmul %0, %1, %cst {dimension_numbers = #tpu.dot_dimension_numbers<[1], [0], [0], [1], [0, 0, 1, 1], [], []>} : vector<16x32xbf16>, vector<32x32xbf16>, vector<16x32xf32> -> vector<16x32xf32>
    %c0_3 = arith.constant 0 : index
    %c0_4 = arith.constant 0 : index
    %3 = vector.load %arg3[%c0_3, %c0_4] : memref<1x32xf32, #tpu.memory_space<vmem>>, vector<1x32xf32>
    %4 = vector.broadcast %3 : vector<1x32xf32> to vector<16x32xf32>
    %5 = arith.addf %2, %4 : vector<16x32xf32>
    %cst_5 = arith.constant 5.000000e-01 : f32
    %6 = vector.broadcast %cst_5 : f32 to vector<16x32xf32>
    %7 = arith.mulf %6, %5 : vector<16x32xf32>
    %cst_6 = arith.constant 4.471500e-02 : f32
    %8 = vector.broadcast %cst_6 : f32 to vector<16x32xf32>
    %9 = arith.mulf %8, %5 : vector<16x32xf32>
    %10 = arith.mulf %9, %5 : vector<16x32xf32>
    %11 = arith.mulf %10, %5 : vector<16x32xf32>
    %12 = arith.addf %5, %11 : vector<16x32xf32>
    %cst_7 = arith.constant 0.797884583 : f32
    %13 = vector.broadcast %cst_7 : f32 to vector<16x32xf32>
    %14 = arith.mulf %13, %12 : vector<16x32xf32>
    %15 = math.tanh %14 : vector<16x32xf32>
    %cst_8 = arith.constant 1.000000e+00 : f32
    %16 = vector.broadcast %cst_8 : f32 to vector<16x32xf32>
    %17 = arith.addf %16, %15 : vector<16x32xf32>
    %18 = arith.mulf %7, %17 : vector<16x32xf32>
    %c0_9 = arith.constant 0 : index
    %c0_10 = arith.constant 0 : index
    %19 = vector.load %arg4[%c0_9, %c0_10] : memref<1x32xbf16, #tpu.memory_space<vmem>>, vector<1x32xbf16>
    %20 = arith.extf %19 : vector<1x32xbf16> to vector<1x32xf32>
    %21 = vector.broadcast %20 : vector<1x32xf32> to vector<16x32xf32>
    %22 = arith.mulf %18, %21 : vector<16x32xf32>
    %cst_11 = arith.constant dense<0.000000e+00> : vector<16xf32>
    %23 = vector.multi_reduction <add>, %22, %cst_11 [1] : vector<16x32xf32> to vector<16xf32>
    %24 = vector.shape_cast %23 : vector<16xf32> to vector<1x16xf32>
    %c0_12 = arith.constant 0 : index
    %c0_13 = arith.constant 0 : index
    %25 = vector.load %arg5[%c0_12, %c0_13] : memref<1x1xf32, #tpu.memory_space<vmem>>, vector<1x1xf32>
    %26 = vector.broadcast %25 : vector<1x1xf32> to vector<1x16xf32>
    %27 = arith.addf %24, %26 : vector<1x16xf32>
    %c0_14 = arith.constant 0 : index
    %c0_15 = arith.constant 0 : index
    %28 = vector.load %arg6[%c0_14, %c0_15] : memref<1x16xf32, #tpu.memory_space<vmem>>, vector<1x16xf32>
    tpu.vector_store %arg6[%c0_14, %c0_15], %27 {strides = array<i32>} : memref<1x16xf32, #tpu.memory_space<vmem>>, vector<1x16xf32>,
    return
  }
  func.func @transform_0(%arg0: i32) -> (i32, i32) {
    %c0_i32 = arith.constant 0 : i32
    %c0_i32_0 = arith.constant 0 : i32
    return %arg0, %c0_i32 : i32, i32
  }
  func.func @transform_1(%arg0: i32) -> (i32, i32) {
    %c0_i32 = arith.constant 0 : i32
    %c0_i32_0 = arith.constant 0 : i32
    %c0_i32_1 = arith.constant 0 : i32
    return %c0_i32, %c0_i32_0 : i32, i32
  }
  func.func @transform_2(%arg0: i32) -> (i32, i32) {
    %c0_i32 = arith.constant 0 : i32
    %c0_i32_0 = arith.constant 0 : i32
    %c0_i32_1 = arith.constant 0 : i32
    return %c0_i32, %c0_i32_0 : i32, i32
  }
  func.func @transform_3(%arg0: i32) -> (i32, i32) {
    %c0_i32 = arith.constant 0 : i32
    %c0_i32_0 = arith.constant 0 : i32
    %c0_i32_1 = arith.constant 0 : i32
    return %c0_i32, %c0_i32_0 : i32, i32
  }
  func.func @transform_4(%arg0: i32) -> (i32, i32) {
    %c0_i32 = arith.constant 0 : i32
    %c0_i32_0 = arith.constant 0 : i32
    %c0_i32_1 = arith.constant 0 : i32
    return %c0_i32, %c0_i32_0 : i32, i32
  }
  func.func @transform_5(%arg0: i32) -> (i32, i32) {
    %c0_i32 = arith.constant 0 : i32
    %c0_i32_0 = arith.constant 0 : i32
    return %c0_i32, %arg0 : i32, i32
  }
}

module attributes {stable_mosaic.version = 11 : i64} {
  func.func @_disc_pred_kernel(%arg0: i32, %arg1: memref<16x32xbf16, #tpu.memory_space<vmem>>, %arg2: memref<32x32xbf16, #tpu.memory_space<vmem>>, %arg3: memref<1x32xf32, #tpu.memory_space<vmem>>, %arg4: memref<1x32xbf16, #tpu.memory_space<vmem>>, %arg5: memref<1x1xf32, #tpu.memory_space<vmem>>, %arg6: memref<1x16xf32, #tpu.memory_space<vmem>>) attributes {dimension_semantics = [#tpu.dimension_semantics<parallel>], iteration_bounds = array<i64: 1>, scalar_prefetch = 0 : i64, scratch_operands = 0 : i64, tpu.core_type = #tpu.core_type<tc>, window_params = [{transform_indices = @transform_0, window_bounds = array<i64: 16, 32>}, {pipeline_mode = #tpu.pipeline_mode<synchronous>, transform_indices = @transform_1, window_bounds = array<i64: 32, 32>}, {pipeline_mode = #tpu.pipeline_mode<synchronous>, transform_indices = @transform_2, window_bounds = array<i64: 1, 32>}, {pipeline_mode = #tpu.pipeline_mode<synchronous>, transform_indices = @transform_3, window_bounds = array<i64: 1, 32>}, {pipeline_mode = #tpu.pipeline_mode<synchronous>, transform_indices = @transform_4, window_bounds = array<i64: 1, 1>}, {transform_indices = @transform_5, window_bounds = array<i64: 1, 16>}]} {
    %c0 = arith.constant 0 : index
    %c0_0 = arith.constant 0 : index
    %0 = vector.load %arg1[%c0, %c0_0] : memref<16x32xbf16, #tpu.memory_space<vmem>>, vector<16x32xbf16>
    %c0_1 = arith.constant 0 : index
    %c0_2 = arith.constant 0 : index
    %1 = vector.load %arg2[%c0_1, %c0_2] : memref<32x32xbf16, #tpu.memory_space<vmem>>, vector<32x32xbf16>
    %cst = arith.constant dense<0.000000e+00> : vector<16x32xf32>
    %2 = tpu.matmul %0, %1, %cst {dimension_numbers = #tpu.dot_dimension_numbers<[1], [0], [0], [1], [0, 0, 1, 1], [], []>} : vector<16x32xbf16>, vector<32x32xbf16>, vector<16x32xf32> -> vector<16x32xf32>
    %c0_3 = arith.constant 0 : index
    %c0_4 = arith.constant 0 : index
    %3 = vector.load %arg3[%c0_3, %c0_4] : memref<1x32xf32, #tpu.memory_space<vmem>>, vector<1x32xf32>
    %4 = vector.broadcast %3 : vector<1x32xf32> to vector<16x32xf32>
    %5 = arith.addf %2, %4 : vector<16x32xf32>
    %cst_5 = arith.constant 5.000000e-01 : f32
    %6 = vector.broadcast %cst_5 : f32 to vector<16x32xf32>
    %7 = arith.mulf %6, %5 : vector<16x32xf32>
    %cst_6 = arith.constant 4.471500e-02 : f32
    %8 = vector.broadcast %cst_6 : f32 to vector<16x32xf32>
    %9 = arith.mulf %8, %5 : vector<16x32xf32>
    %10 = arith.mulf %9, %5 : vector<16x32xf32>
    %11 = arith.mulf %10, %5 : vector<16x32xf32>
    %12 = arith.addf %5, %11 : vector<16x32xf32>
    %cst_7 = arith.constant 0.797884583 : f32
    %13 = vector.broadcast %cst_7 : f32 to vector<16x32xf32>
    %14 = arith.mulf %13, %12 : vector<16x32xf32>
    %15 = math.tanh %14 : vector<16x32xf32>
    %cst_8 = arith.constant 1.000000e+00 : f32
    %16 = vector.broadcast %cst_8 : f32 to vector<16x32xf32>
    %17 = arith.addf %16, %15 : vector<16x32xf32>
    %18 = arith.mulf %7, %17 : vector<16x32xf32>
    %c0_9 = arith.constant 0 : index
    %c0_10 = arith.constant 0 : index
    %19 = vector.load %arg4[%c0_9, %c0_10] : memref<1x32xbf16, #tpu.memory_space<vmem>>, vector<1x32xbf16>
    %20 = arith.extf %19 : vector<1x32xbf16> to vector<1x32xf32>
    %21 = vector.broadcast %20 : vector<1x32xf32> to vector<16x32xf32>
    %22 = arith.mulf %18, %21 : vector<16x32xf32>
    %cst_11 = arith.constant dense<0.000000e+00> : vector<16xf32>
    %23 = vector.multi_reduction <add>, %22, %cst_11 [1] : vector<16x32xf32> to vector<16xf32>
    %24 = vector.shape_cast %23 : vector<16xf32> to vector<1x16xf32>
    %c0_12 = arith.constant 0 : index
    %c0_13 = arith.constant 0 : index
    %25 = vector.load %arg5[%c0_12, %c0_13] : memref<1x1xf32, #tpu.memory_space<vmem>>, vector<1x1xf32>
    %26 = vector.broadcast %25 : vector<1x1xf32> to vector<1x16xf32>
    %27 = arith.addf %24, %26 : vector<1x16xf32>
    %c0_14 = arith.constant 0 : index
    %c0_15 = arith.constant 0 : index
    %28 = vector.load %arg6[%c0_14, %c0_15] : memref<1x16xf32, #tpu.memory_space<vmem>>, vector<1x16xf32>
    tpu.vector_store %arg6[%c0_14, %c0_15], %27 {strides = array<i32>} : memref<1x16xf32, #tpu.memory_space<vmem>>, vector<1x16xf32>,
    return
  }
  func.func @transform_0(%arg0: i32) -> (i32, i32) {
    %c0_i32 = arith.constant 0 : i32
    %c0_i32_0 = arith.constant 0 : i32
    return %arg0, %c0_i32 : i32, i32
  }
  func.func @transform_1(%arg0: i32) -> (i32, i32) {
    %c0_i32 = arith.constant 0 : i32
    %c0_i32_0 = arith.constant 0 : i32
    %c0_i32_1 = arith.constant 0 : i32
    return %c0_i32, %c0_i32_0 : i32, i32
  }
  func.func @transform_2(%arg0: i32) -> (i32, i32) {
    %c0_i32 = arith.constant 0 : i32
    %c0_i32_0 = arith.constant 0 : i32
    %c0_i32_1 = arith.constant 0 : i32
    return %c0_i32, %c0_i32_0 : i32, i32
  }
  func.func @transform_3(%arg0: i32) -> (i32, i32) {
    %c0_i32 = arith.constant 0 : i32
    %c0_i32_0 = arith.constant 0 : i32
    %c0_i32_1 = arith.constant 0 : i32
    return %c0_i32, %c0_i32_0 : i32, i32
  }
  func.func @transform_4(%arg0: i32) -> (i32, i32) {
    %c0_i32 = arith.constant 0 : i32
    %c0_i32_0 = arith.constant 0 : i32
    %c0_i32_1 = arith.constant 0 : i32
    return %c0_i32, %c0_i32_0 : i32, i32
  }
  func.func @transform_5(%arg0: i32) -> (i32, i32) {
    %c0_i32 = arith.constant 0 : i32
    %c0_i32_0 = arith.constant 0 : i32
    return %c0_i32, %arg0 : i32, i32
  }
}

</mosaic_0001>

<bundles_post_ra>
// kernel: tpu_custom_call.1
= control target key start
LH: loop header
LB: loop body
LE: loop exit
PB: predicated region body
PF: predicated region fallthrough
CT: control target
= control target key end

     0   :  { %s396_s0 = inlined_call_operand.hbm [shape: bf16[16,32], index: 0, kind: input, shape index: {}]   ;;  %s397_s1 = inlined_call_operand.hbm [shape: bf16[32,32], index: 1, kind: input, shape index: {}]   ;;  %s398_s2 = inlined_call_operand.vmem [shape: f32[1,32], index: 2, kind: input, shape index: {}]   ;;  %s399_s3 = inlined_call_operand.vmem [shape: bf16[1,32], index: 3, kind: input, shape index: {}]   ;;  %s400_s4 = inlined_call_operand.<no memory space> [shape: f32[1,1], index: 4, kind: input, shape index: {}]   ;;  %s401_s5 = inlined_call_operand.hbm [shape: f32[1,16], index: 5, kind: output, shape index: {}]  }
   0x1   :  { %v10_v0 = vstv %s400_s4 }
   0x2   :  { %11 = vst [vmem:[#allocation2] sm:$0x1] %v10_v0 }
   0x3   :  { %12 = vsyncpa [#allocation4], 0 }
   0x4   :  { %13 = vsyncpa [#allocation7], 0 }
   0x5   :  { %14 = vsyncpa [#allocation5], 0  ;;  %s310_s20 = smov [#allocation3]   ;;  %s238_s24 = scalar_lea.hbm %s396_s0, 128 }
   0x6   :  { %s20_s21 = sshll.u32 %s310_s20, 4  ;;  %p239_p0 = scmp.ne.s32.totalorder %s396_s0, %s238_s24  ;;  %s21_s21 = int_to_ptr.vmem [resolvable:$true] %s20_s21 }
   0x7   :  { %p242_p1 = scmp.lt.u32.totalorder %s238_s24, %s396_s0 }
   0x9   :  { %p244_p2 = pnand %p242_p1, %p239_p0 }
   0xb   :  { %247 = shalt.err (!%p244_p2)
}
   0xc   :  { %s248_s4 = scalar_lea.vmem %s21_s21, 128  ;;  %p253_p4 = scmp.lt.s32.totalorder %s21_s21, %s21_s21 }
   0xd   :  { %p249_p3 = scmp.ne.s32.totalorder %s21_s21, %s248_s4  ;;  %p254_p5 = scmp.lt.s32.totalorder %s248_s4, %s248_s4 }
   0xf   :  { %p255_p6 = por %p254_p5, %p253_p4 }
  0x11   :  { %p256_p7 = pnand %p255_p6, %p249_p3 }
  0x13   :  { %259 = shalt.err (!%p256_p7)
}
  0x14   :  { %s311_s29 = smov 64   ;;  %s312_s30 = smov 4  }
  0x15   :  { %26 = dma.hbm_to_vmem [thread:$0]  %s396_s0, 128, %s21_s21, [#allocation4], %s311_s29, %s311_s29, %s312_s30  }
  0x16   :  { %s313_s8 = smov [#allocation6]   ;;  %s260_s12 = scalar_lea.hbm %s397_s1, 256 }
  0x17   :  { %s32_s9 = sshll.u32 %s313_s8, 4  ;;  %p261_p8 = scmp.ne.s32.totalorder %s397_s1, %s260_s12  ;;  %s33_s9 = int_to_ptr.vmem [resolvable:$true] %s32_s9 }
  0x18   :  { %p264_p9 = scmp.lt.u32.totalorder %s260_s12, %s397_s1 }
  0x1a   :  { %p266_p10 = pnand %p264_p9, %p261_p8 }
  0x1c   :  { %269 = shalt.err (!%p266_p10)
}
  0x1d   :  { %s270_s17 = scalar_lea.vmem %s33_s9, 256  ;;  %p275_p12 = scmp.lt.s32.totalorder %s33_s9, %s33_s9 }
  0x1e   :  { %p271_p11 = scmp.ne.s32.totalorder %s33_s9, %s270_s17  ;;  %p276_p13 = scmp.lt.s32.totalorder %s270_s17, %s270_s17 }
  0x20   :  { %p277_p0 = por %p276_p13, %p275_p12 }
  0x22   :  { %p278_p1 = pnand %p277_p0, %p271_p11 }
  0x24   :  { %281 = shalt.err (!%p278_p1)
}
  0x25   :  { %38 = dma.hbm_to_vmem [thread:$0]  %s397_s1, 256, %s33_s9, [#allocation7], %s311_s29, %s311_s29, %s312_s30  }
  0x26   :  { %304 = dma.done.wait [#allocation4], 128  }
  0x27   :  { %305 = vsyncadd [#allocation4], 4294967168 }
  0x28   :  { %306 = dma.done.wait [#allocation7], 256  }
  0x29   :  { %307 = vsyncadd [#allocation7], 4294967040  ;;  %v314_v1 = vmov 0.0   ;;  %vm315_vm0 = vmmov 0   ;;  %v231_v2 = vld [vmem:[#allocation6] sm:$0xff]   ;;  %v232_v3 = vld [vmem:[#allocation6 + $0x8] sm:$0xff]   ;;  %v147_v23 = vlaneseq }
  0x2a   :  { %213 = vmatprep.subr.bf16.mxu0 %v314_v1  ;;  %217 = vmatprep.mubr.msk.bf16.mxu0 %vm315_vm0, %v314_v1  ;;  %v233_v4 = vld [vmem:[#allocation3] sm:$0xff]   ;;  %vm82_vm1 = vcmask 261120   ;;  %v159_v5 = vld [vmem:[#allocation2] sm:$0x1]  ;;  %v316_v6 = vmov 0   ;;  %vm184_vm2 = vcmask 130112  }
  0x2b   :  { %214 = vmatpush3.bf16.msra.mxu0 %v231_v2  ;;  %229 = vset.pattern.permute.xlu1 %v316_v6  ;;  %v205_v7 = vld [vmem:[%s398_s2] ss:$0 sm:$0xff]  ;;  %v148_v25 = vshrl.u32 %v147_v23, 7  ;;  %v174_v43 = vand.u32 127, %v147_v23  ;;  %vm187_vm3 = vcmask 122880  }
  0x2c   :  { %215 = vmatprep.subr.bf16.mxu0 %v314_v1  ;;  %230 = vset.pattern.permute.xlu0 %v316_v6  ;;  %v145_v26 = vld [vmem:[%s399_s3] sm:$0x1]  ;;  %s317_s3 = smov [#allocation8]  }
  0x2d   :  { %162 = vperm.xlu1 %229, %v159_v5   ;;  %v146_v27 = vunpack.c.l.bf16 %v145_v26  ;;  %v149_v28 = vsub.s32 0, %v148_v25  ;;  %v179_v45 = vadd.s32 4294967288, %v174_v43  ;;  %v177_v47 = vsub.s32 %v174_v43, %v148_v25  ;;  %s195_s21 = sshll.u32 %s317_s3, 4  ;;  %s196_s21 = int_to_ptr.vmem [resolvable:$true] %s195_s21 }
  0x2e   :  { %s282_s22 = scalar_lea.vmem %s196_s21, 16  ;;  %s286_s23 = scalar_lea.vmem %s196_s21, 32 }
  0x2f   :  { %216 = vmatpush3.bf16.msra.mxu0 %v232_v3  ;;  %v150_v32 = vrot.slane %v146_v27, %v149_v28  ;;  %v182_v49 = vsub.s32 %v179_v45, %v148_v25  ;;  %p283_p2 = scmp.ne.s32.totalorder %s196_s21, %s282_s22  ;;  %p287_p3 = scmp.lt.s32.totalorder %s196_s21, %s196_s21 }
  0x30   :  { %p288_p4 = scmp.lt.s32.totalorder %s286_s23, %s282_s22 }
  0x32   :  { %218 = vmatmul.mubr.msk.bf16.vlgmr.msra.gmra.mrb[0].mxu0 %vm82_vm1, %v233_v4  ;;  %p289_p5 = por %p288_p4, %p287_p3 }
  0x34   :  { %p290_p6 = pnand %p289_p5, %p283_p2 }
  0xac   :  { %v163_v42 = vpop.permute.xlu1 %162 }
  0xad   :  { %v168_v44 = vrot.slane %v163_v42, %v149_v28 }
 0x105   :  { %v120_v8 = vpop.f32.mrb[0].mxu0 }
 0x106   :  { %v121_v9 = vadd.f32 %v205_v7, %v120_v8  ;;  %v219_v10 = vpop.f32.mrb[1].mxu0 }
 0x107   :  { %v123_v11 = vpop.f32.mrb[2].mxu0 }
 0x108   :  { %v129_v12 = vmul.f32 0.044715, %v121_v9  ;;  %v124_v13 = vadd.f32 %v205_v7, %v123_v11  ;;  %v220_v14 = vpop.f32.mrb[3].mxu0  ;;  %v127_v30 = vmul.f32 0.5, %v121_v9 }
 0x10a   :  { %v131_v15 = vmul.f32 %v129_v12, %v121_v9  ;;  %v130_v16 = vmul.f32 0.044715, %v124_v13  ;;  %v128_v35 = vmul.f32 0.5, %v124_v13 }
 0x10c   :  { %v132_v17 = vmul.f32 %v130_v16, %v124_v13  ;;  %v133_v18 = vmul.f32 %v131_v15, %v121_v9 }
 0x10e   :  { %v135_v19 = vadd.f32 %v133_v18, %v121_v9  ;;  %v134_v20 = vmul.f32 %v132_v17, %v124_v13 }
 0x110   :  { %v137_v21 = vmul.f32 0.7978846, %v135_v19  ;;  %v136_v22 = vadd.f32 %v134_v20, %v124_v13 }
 0x112   :  { %234 = vtanh.f32 %v137_v21  ;;  %v138_v24 = vmul.f32 0.7978846, %v136_v22 }
 0x114   :  { %236 = vtanh.f32 %v138_v24 }
 0x11c   :  { %v235_v29 = vpop.eup %234 }
 0x11d   :  { %v141_v31 = vadd.f32 1.0, %v235_v29 }
 0x11e   :  { %v237_v33 = vpop.eup %236 }
 0x11f   :  { %v143_v34 = vmul.f32 %v141_v31, %v127_v30  ;;  %v142_v36 = vadd.f32 1.0, %v237_v33 }
 0x121   :  { %v151_v37 = vmul.f32 %v150_v32, %v143_v34  ;;  %v144_v38 = vmul.f32 %v142_v36, %v128_v35 }
 0x123   :  { %v153_v39 = vsel %vm82_vm1, %v151_v37, 0.0  ;;  %v152_v40 = vmul.f32 %v150_v32, %v144_v38 }
 0x124   :  { %154 = vadd.xlane.f32.xlu0 %v153_v39 }
 0x125   :  { %v156_v41 = vsel %vm82_vm1, %v152_v40, 0.0 }
 0x128   :  { %157 = vadd.xlane.f32.xlu0 %v156_v41 }
 0x1b1   :  { %v155_v46 = vpop.xlane.xlu0 %154 }
 0x1b2   :  { %v169_v48 = vadd.f32 %v168_v44, %v155_v46 }
 0x1b4   :  { %v178_v52 = vrot.slane %v169_v48, %v177_v47 }
 0x1b5   :  { %v158_v50 = vpop.xlane.xlu0 %157 }
 0x1b6   :  { %v170_v51 = vadd.f32 %v168_v44, %v158_v50 }
 0x1b8   :  { %v183_v53 = vrot.slane %v170_v51, %v182_v49 }
 0x1ba   :  { %v185_v54 = vsel %vm184_vm2, %v183_v53, %v178_v52 }
 0x1bb   :  { %188 = vst.msk [vmem:[#allocation8] sm:$0x1] %vm187_vm3, %v185_v54 }
 0x1bc   :  { %293 = shalt.err (!%p290_p6)
}
 0x1bd   :  { %s294_s26 = scalar_lea.hbm %s401_s5, 16 }
 0x1be   :  { %p295_p7 = scmp.ne.s32.totalorder %s401_s5, %s294_s26  ;;  %p298_p8 = scmp.lt.u32.totalorder %s294_s26, %s401_s5 }
 0x1c0   :  { %p300_p9 = pnand %p298_p8, %p295_p7 }
 0x1c2   :  { %303 = shalt.err (!%p300_p9)
}
 0x1c3   :  { %198 = dma.vmem_to_hbm [thread:$0]  %s196_s21, 16, %s401_s5, [#allocation5]  }
 0x1c4   :  { %308 = dma.done.wait [#allocation5], 16  }
 0x1c5   :  { %309 = vsyncadd [#allocation5], 4294967280 }
 0x1c6   :  { %202 = vsyncpa [#allocation4], 1 }
 0x1c7   :  { %203 = vsyncpa [#allocation7], 1 }
 0x1c8   :  { %204 = vsyncpa [#allocation5], 1 }

// kernel: tpu_custom_call.1
= control target key start
LH: loop header
LB: loop body
LE: loop exit
PB: predicated region body
PF: predicated region fallthrough
CT: control target
= control target key end

     0   :  { %s396_s0 = inlined_call_operand.hbm [shape: bf16[16,32], index: 0, kind: input, shape index: {}]   ;;  %s397_s1 = inlined_call_operand.hbm [shape: bf16[32,32], index: 1, kind: input, shape index: {}]   ;;  %s398_s2 = inlined_call_operand.vmem [shape: f32[1,32], index: 2, kind: input, shape index: {}]   ;;  %s399_s3 = inlined_call_operand.vmem [shape: bf16[1,32], index: 3, kind: input, shape index: {}]   ;;  %s400_s4 = inlined_call_operand.<no memory space> [shape: f32[1,1], index: 4, kind: input, shape index: {}]   ;;  %s401_s5 = inlined_call_operand.hbm [shape: f32[1,16], index: 5, kind: output, shape index: {}]  }
   0x1   :  { %v10_v0 = vstv %s400_s4 }
   0x2   :  { %11 = vst [vmem:[#allocation2] sm:$0x1] %v10_v0 }
   0x3   :  { %12 = vsyncpa [#allocation4], 0 }
   0x4   :  { %13 = vsyncpa [#allocation7], 0 }
   0x5   :  { %14 = vsyncpa [#allocation5], 0  ;;  %s310_s20 = smov [#allocation3]   ;;  %s238_s24 = scalar_lea.hbm %s396_s0, 128 }
   0x6   :  { %s20_s21 = sshll.u32 %s310_s20, 4  ;;  %p239_p0 = scmp.ne.s32.totalorder %s396_s0, %s238_s24  ;;  %s21_s21 = int_to_ptr.vmem [resolvable:$true] %s20_s21 }
   0x7   :  { %p242_p1 = scmp.lt.u32.totalorder %s238_s24, %s396_s0 }
   0x9   :  { %p244_p2 = pnand %p242_p1, %p239_p0 }
   0xb   :  { %247 = shalt.err (!%p244_p2)
}
   0xc   :  { %s248_s4 = scalar_lea.vmem %s21_s21, 128  ;;  %p253_p4 = scmp.lt.s32.totalorder %s21_s21, %s21_s21 }
   0xd   :  { %p249_p3 = scmp.ne.s32.totalorder %s21_s21, %s248_s4  ;;  %p254_p5 = scmp.lt.s32.totalorder %s248_s4, %s248_s4 }
   0xf   :  { %p255_p6 = por %p254_p5, %p253_p4 }
  0x11   :  { %p256_p7 = pnand %p255_p6, %p249_p3 }
  0x13   :  { %259 = shalt.err (!%p256_p7)
}
  0x14   :  { %s311_s29 = smov 64   ;;  %s312_s30 = smov 4  }
  0x15   :  { %26 = dma.hbm_to_vmem [thread:$0]  %s396_s0, 128, %s21_s21, [#allocation4], %s311_s29, %s311_s29, %s312_s30  }
  0x16   :  { %s313_s8 = smov [#allocation6]   ;;  %s260_s12 = scalar_lea.hbm %s397_s1, 256 }
  0x17   :  { %s32_s9 = sshll.u32 %s313_s8, 4  ;;  %p261_p8 = scmp.ne.s32.totalorder %s397_s1, %s260_s12  ;;  %s33_s9 = int_to_ptr.vmem [resolvable:$true] %s32_s9 }
  0x18   :  { %p264_p9 = scmp.lt.u32.totalorder %s260_s12, %s397_s1 }
  0x1a   :  { %p266_p10 = pnand %p264_p9, %p261_p8 }
  0x1c   :  { %269 = shalt.err (!%p266_p10)
}
  0x1d   :  { %s270_s17 = scalar_lea.vmem %s33_s9, 256  ;;  %p275_p12 = scmp.lt.s32.totalorder %s33_s9, %s33_s9 }
  0x1e   :  { %p271_p11 = scmp.ne.s32.totalorder %s33_s9, %s270_s17  ;;  %p276_p13 = scmp.lt.s32.totalorder %s270_s17, %s270_s17 }
  0x20   :  { %p277_p0 = por %p276_p13, %p275_p12 }
  0x22   :  { %p278_p1 = pnand %p277_p0, %p271_p11 }
  0x24   :  { %281 = shalt.err (!%p278_p1)
}
  0x25   :  { %38 = dma.hbm_to_vmem [thread:$0]  %s397_s1, 256, %s33_s9, [#allocation7], %s311_s29, %s311_s29, %s312_s30  }
  0x26   :  { %304 = dma.done.wait [#allocation4], 128  }
  0x27   :  { %305 = vsyncadd [#allocation4], 4294967168 }
  0x28   :  { %306 = dma.done.wait [#allocation7], 256  }
  0x29   :  { %307 = vsyncadd [#allocation7], 4294967040  ;;  %v314_v1 = vmov 0.0   ;;  %vm315_vm0 = vmmov 0   ;;  %v231_v2 = vld [vmem:[#allocation6] sm:$0xff]   ;;  %v232_v3 = vld [vmem:[#allocation6 + $0x8] sm:$0xff]   ;;  %v147_v23 = vlaneseq }
  0x2a   :  { %213 = vmatprep.subr.bf16.mxu0 %v314_v1  ;;  %217 = vmatprep.mubr.msk.bf16.mxu0 %vm315_vm0, %v314_v1  ;;  %v233_v4 = vld [vmem:[#allocation3] sm:$0xff]   ;;  %vm82_vm1 = vcmask 261120   ;;  %v159_v5 = vld [vmem:[#allocation2] sm:$0x1]  ;;  %v316_v6 = vmov 0   ;;  %vm184_vm2 = vcmask 130112  }
  0x2b   :  { %214 = vmatpush3.bf16.msra.mxu0 %v231_v2  ;;  %229 = vset.pattern.permute.xlu1 %v316_v6  ;;  %v205_v7 = vld [vmem:[%s398_s2] ss:$0 sm:$0xff]  ;;  %v148_v25 = vshrl.u32 %v147_v23, 7  ;;  %v174_v43 = vand.u32 127, %v147_v23  ;;  %vm187_vm3 = vcmask 122880  }
  0x2c   :  { %215 = vmatprep.subr.bf16.mxu0 %v314_v1  ;;  %230 = vset.pattern.permute.xlu0 %v316_v6  ;;  %v145_v26 = vld [vmem:[%s399_s3] sm:$0x1]  ;;  %s317_s3 = smov [#allocation8]  }
  0x2d   :  { %162 = vperm.xlu1 %229, %v159_v5   ;;  %v146_v27 = vunpack.c.l.bf16 %v145_v26  ;;  %v149_v28 = vsub.s32 0, %v148_v25  ;;  %v179_v45 = vadd.s32 4294967288, %v174_v43  ;;  %v177_v47 = vsub.s32 %v174_v43, %v148_v25  ;;  %s195_s21 = sshll.u32 %s317_s3, 4  ;;  %s196_s21 = int_to_ptr.vmem [resolvable:$true] %s195_s21 }
  0x2e   :  { %s282_s22 = scalar_lea.vmem %s196_s21, 16  ;;  %s286_s23 = scalar_lea.vmem %s196_s21, 32 }
  0x2f   :  { %216 = vmatpush3.bf16.msra.mxu0 %v232_v3  ;;  %v150_v32 = vrot.slane %v146_v27, %v149_v28  ;;  %v182_v49 = vsub.s32 %v179_v45, %v148_v25  ;;  %p283_p2 = scmp.ne.s32.totalorder %s196_s21, %s282_s22  ;;  %p287_p3 = scmp.lt.s32.totalorder %s196_s21, %s196_s21 }
  0x30   :  { %p288_p4 = scmp.lt.s32.totalorder %s286_s23, %s282_s22 }
  0x32   :  { %218 = vmatmul.mubr.msk.bf16.vlgmr.msra.gmra.mrb[0].mxu0 %vm82_vm1, %v233_v4  ;;  %p289_p5 = por %p288_p4, %p287_p3 }
  0x34   :  { %p290_p6 = pnand %p289_p5, %p283_p2 }
  0xac   :  { %v163_v42 = vpop.permute.xlu1 %162 }
  0xad   :  { %v168_v44 = vrot.slane %v163_v42, %v149_v28 }
 0x105   :  { %v120_v8 = vpop.f32.mrb[0].mxu0 }
 0x106   :  { %v121_v9 = vadd.f32 %v205_v7, %v120_v8  ;;  %v219_v10 = vpop.f32.mrb[1].mxu0 }
 0x107   :  { %v123_v11 = vpop.f32.mrb[2].mxu0 }
 0x108   :  { %v129_v12 = vmul.f32 0.044715, %v121_v9  ;;  %v124_v13 = vadd.f32 %v205_v7, %v123_v11  ;;  %v220_v14 = vpop.f32.mrb[3].mxu0  ;;  %v127_v30 = vmul.f32 0.5, %v121_v9 }
 0x10a   :  { %v131_v15 = vmul.f32 %v129_v12, %v121_v9  ;;  %v130_v16 = vmul.f32 0.044715, %v124_v13  ;;  %v128_v35 = vmul.f32 0.5, %v124_v13 }
 0x10c   :  { %v132_v17 = vmul.f32 %v130_v16, %v124_v13  ;;  %v133_v18 = vmul.f32 %v131_v15, %v121_v9 }
 0x10e   :  { %v135_v19 = vadd.f32 %v133_v18, %v121_v9  ;;  %v134_v20 = vmul.f32 %v132_v17, %v124_v13 }
 0x110   :  { %v137_v21 = vmul.f32 0.7978846, %v135_v19  ;;  %v136_v22 = vadd.f32 %v134_v20, %v124_v13 }
 0x112   :  { %234 = vtanh.f32 %v137_v21  ;;  %v138_v24 = vmul.f32 0.7978846, %v136_v22 }
 0x114   :  { %236 = vtanh.f32 %v138_v24 }
 0x11c   :  { %v235_v29 = vpop.eup %234 }
 0x11d   :  { %v141_v31 = vadd.f32 1.0, %v235_v29 }
 0x11e   :  { %v237_v33 = vpop.eup %236 }
 0x11f   :  { %v143_v34 = vmul.f32 %v141_v31, %v127_v30  ;;  %v142_v36 = vadd.f32 1.0, %v237_v33 }
 0x121   :  { %v151_v37 = vmul.f32 %v150_v32, %v143_v34  ;;  %v144_v38 = vmul.f32 %v142_v36, %v128_v35 }
 0x123   :  { %v153_v39 = vsel %vm82_vm1, %v151_v37, 0.0  ;;  %v152_v40 = vmul.f32 %v150_v32, %v144_v38 }
 0x124   :  { %154 = vadd.xlane.f32.xlu0 %v153_v39 }
 0x125   :  { %v156_v41 = vsel %vm82_vm1, %v152_v40, 0.0 }
 0x128   :  { %157 = vadd.xlane.f32.xlu0 %v156_v41 }
 0x1b1   :  { %v155_v46 = vpop.xlane.xlu0 %154 }
 0x1b2   :  { %v169_v48 = vadd.f32 %v168_v44, %v155_v46 }
 0x1b4   :  { %v178_v52 = vrot.slane %v169_v48, %v177_v47 }
 0x1b5   :  { %v158_v50 = vpop.xlane.xlu0 %157 }
 0x1b6   :  { %v170_v51 = vadd.f32 %v168_v44, %v158_v50 }
 0x1b8   :  { %v183_v53 = vrot.slane %v170_v51, %v182_v49 }
 0x1ba   :  { %v185_v54 = vsel %vm184_vm2, %v183_v53, %v178_v52 }
 0x1bb   :  { %188 = vst.msk [vmem:[#allocation8] sm:$0x1] %vm187_vm3, %v185_v54 }
 0x1bc   :  { %293 = shalt.err (!%p290_p6)
}
 0x1bd   :  { %s294_s26 = scalar_lea.hbm %s401_s5, 16 }
 0x1be   :  { %p295_p7 = scmp.ne.s32.totalorder %s401_s5, %s294_s26  ;;  %p298_p8 = scmp.lt.u32.totalorder %s294_s26, %s401_s5 }
 0x1c0   :  { %p300_p9 = pnand %p298_p8, %p295_p7 }
 0x1c2   :  { %303 = shalt.err (!%p300_p9)
}
 0x1c3   :  { %198 = dma.vmem_to_hbm [thread:$0]  %s196_s21, 16, %s401_s5, [#allocation5]  }
 0x1c4   :  { %308 = dma.done.wait [#allocation5], 16  }
 0x1c5   :  { %309 = vsyncadd [#allocation5], 4294967280 }
 0x1c6   :  { %202 = vsyncpa [#allocation4], 1 }
 0x1c7   :  { %203 = vsyncpa [#allocation7], 1 }
 0x1c8   :  { %204 = vsyncpa [#allocation5], 1 }

</bundles_post_ra>
